<compile_context>
chip_gen: v5e
topology: v5e:2x2
jax: 0.10.0
libtpu: 0.0.40
codegen_flags: <defaults>
</compile_context>

<pallas_src>
import jax
import jax.numpy as jnp
from jax.experimental import pallas as pl
from jax.experimental.pallas import tpu as pltpu


def _round_up(x, m):
    return ((x + m - 1) // m) * m


def _pick_tile(dim_pad, cap):
    """dim_pad is a multiple of 128; largest multiple of 128 <= cap dividing dim_pad."""
    t = max(128, min(dim_pad, (int(cap) // 128) * 128))
    while dim_pad % t != 0:
        t -= 128
    return t


def _gating_lora_kernel(x_ref, w_org_ref, b_ref, w_down_ref, w_up_ref,
                        o_ref, acc_ref, d_ref):
    """Grid = (i: M tiles, j: N tiles, k: K tiles); K is the reduction axis (last).

    acc_ref: (tm, tn)    f32 accumulator for org-linear (+ bias hoisted into init).
    d_ref:   (tm, r_pad) f32 accumulator for the LoRA down projection; computed only
             during the j == 0 sweep and reused (scratch persists) for every N tile.
    """
    j = pl.program_id(1)
    k = pl.program_id(2)
    nk = pl.num_programs(2)

    @pl.when(k == 0)
    def _init_acc():
        # Bias folded into accumulator init (single broadcast per output tile).
        acc_ref[...] = jnp.broadcast_to(b_ref[...].astype(jnp.float32), acc_ref.shape)

    x = x_ref[...]                                                     # (tm, tk)
    # Original Linear partial product: x_tile @ W_org^T tile -> (tm, tn)
    acc_ref[...] += jnp.dot(x, w_org_ref[...], preferred_element_type=jnp.float32)

    @pl.when(jnp.logical_and(j == 0, k == 0))
    def _init_d():
        d_ref[...] = jnp.zeros_like(d_ref)

    # LoRA down projection only on the first N tile; d_ref is reused for j > 0.
    @pl.when(j == 0)
    def _down():
        d_ref[...] += jnp.dot(x, w_down_ref[...], preferred_element_type=jnp.float32)

    @pl.when(k == nk - 1)
    def _finalize():
        # Up projection with gate & (multiplier*scale) pre-folded: (tm, r) @ (r, tn).
        u = jnp.dot(d_ref[...].astype(w_up_ref.dtype), w_up_ref[...],
                    preferred_element_type=jnp.float32)
        o_ref[...] = (acc_ref[...] + u).astype(o_ref.dtype)


def prepare_gating_lora_params(w_org, b_org, w_down, w_up, gate, *,
                               multiplier, scale, compute_dtype=None):
    """One-time weight transform (hoisted out of the per-forward path):
    transpose weights, fold gate and multiplier*scale into W_up (in full precision,
    single cast at the end), zero-pad in/out/r dims to 128 multiples (lane-dense),
    and cast everything to the compute dtype.

    w_org: [out, in]; b_org: [out]; w_down: [r, in]; w_up: [out, r]; gate: [1, r].
    """
    out_dim, in_dim = w_org.shape
    r = w_down.shape[0]
    dt = jnp.dtype(compute_dtype) if compute_dtype is not None else w_org.dtype
    k_pad = _round_up(in_dim, 128)
    n_pad = _round_up(out_dim, 128)
    r_pad = _round_up(r, 128)
    coef = float(multiplier) * float(scale)

    w_org_t = jnp.zeros((k_pad, n_pad), dt).at[:in_dim, :out_dim].set(w_org.T.astype(dt))
    b = jnp.zeros((1, n_pad), dt).at[:, :out_dim].set(b_org.reshape(1, out_dim).astype(dt))
    w_down_t = jnp.zeros((k_pad, r_pad), dt).at[:in_dim, :r].set(w_down.T.astype(dt))
    w_up_eff = (w_up.T * gate.reshape(r, 1) * coef).astype(dt)        # [r, out]
    w_up_eff = jnp.zeros((r_pad, n_pad), dt).at[:r, :out_dim].set(w_up_eff)

    params = dict(w_org_t=w_org_t, b=b, w_down_t=w_down_t, w_up_eff=w_up_eff)
    return params, out_dim


def gating_lora_linear(x, params, out_dim, *, tm=256, tn_cap=512, tk_cap=512,
                       vmem_budget_bytes=40 * 1024 * 1024):
    """x: [M, in_dim]. params from prepare_gating_lora_params. Returns [M, out_dim]."""
    w_org_t = params["w_org_t"]
    b = params["b"]
    w_down_t = params["w_down_t"]
    w_up_eff = params["w_up_eff"]

    k_pad, n_pad = w_org_t.shape
    r_pad = w_up_eff.shape[0]
    compute_dtype = w_org_t.dtype
    out_dtype = x.dtype

    M, in_dim = x.shape
    assert in_dim <= k_pad

    x = x.astype(compute_dtype)
    if in_dim != k_pad:
        x = jnp.pad(x, ((0, 0), (0, k_pad - in_dim)))   # zero-pad K: contributes 0

    # ---- tile selection against an explicit VMEM budget ----------------------
    isz = jnp.dtype(compute_dtype).itemsize
    osz = jnp.dtype(out_dtype).itemsize
    tm_eff = min(int(tm), _round_up(M, 8))              # multiple of 8 (sublane)
    tn = _pick_tile(n_pad, tn_cap)
    tk = _pick_tile(k_pad, tk_cap)

    def vmem_bytes(tm_, tn_, tk_):
        dbuf = 2 * (tm_ * tk_ + tk_ * tn_ + 8 * tn_ + tk_ * r_pad + r_pad * tn_) * isz
        dbuf += 2 * tm_ * tn_ * osz
        scratch = (tm_ * tn_ + tm_ * r_pad) * 4
        return dbuf + scratch

    while vmem_bytes(tm_eff, tn, tk) > vmem_budget_bytes:
        if tk > 128:
            tk = _pick_tile(k_pad, tk - 128)
        elif tn > 128:
            tn = _pick_tile(n_pad, tn - 128)
        elif tm_eff > 8:
            tm_eff = max(8, _round_up(tm_eff // 2, 8))
        else:
            break

    m_pad = _round_up(M, tm_eff)
    if m_pad != M:
        x = jnp.pad(x, ((0, m_pad - M), (0, 0)))        # padded rows sliced off below

    grid = (m_pad // tm_eff, n_pad // tn, k_pad // tk)
    n_k = grid[2]

    # W_down index map: stream K blocks only during j == 0; for j > 0 the index pins
    # to the last K block (same as the previous grid step) => no redundant re-DMA.
    def w_down_map(i, j, k):
        return (jnp.minimum(k + j * n_k, n_k - 1), 0)

    # ---- cost estimate (advisory; reflects the gated down-projection) --------
    flops = 2 * m_pad * (n_pad * k_pad + r_pad * k_pad + r_pad * n_pad)
    bytes_accessed = (
        (n_pad // tn) * m_pad * k_pad * isz             # x re-streamed per N tile
        + (m_pad // tm_eff) * k_pad * n_pad * isz       # W_org re-streamed per M tile
        + (m_pad // tm_eff) * k_pad * r_pad * isz       # W_down once per M tile
        + (m_pad // tm_eff) * r_pad * n_pad * isz       # W_up once per M tile
        + n_pad * isz
        + m_pad * n_pad * osz
    )
    cost = pl.CostEstimate(flops=int(flops), transcendentals=0,
                           bytes_accessed=int(bytes_accessed))

    out = pl.pallas_call(
        _gating_lora_kernel,
        out_shape=jax.ShapeDtypeStruct((m_pad, n_pad), out_dtype),
        grid_spec=pltpu.PrefetchScalarGridSpec(
            num_scalar_prefetch=0,
            grid=grid,
            in_specs=[
                pl.BlockSpec((tm_eff, tk), lambda i, j, k: (i, k)),   # x tile
                pl.BlockSpec((tk, tn), lambda i, j, k: (k, j)),       # W_org^T tile
                pl.BlockSpec((1, tn), lambda i, j, k: (0, j)),        # bias tile
                pl.BlockSpec((tk, r_pad), w_down_map),                # W_down^T tile
                pl.BlockSpec((r_pad, tn), lambda i, j, k: (0, j)),    # W_up_eff tile
            ],
            out_specs=pl.BlockSpec((tm_eff, tn), lambda i, j, k: (i, j)),
            scratch_shapes=[
                pltpu.VMEM((tm_eff, tn), jnp.float32),                # org-linear acc
                pltpu.VMEM((tm_eff, r_pad), jnp.float32),             # LoRA-down acc
            ],
        ),
        compiler_params=pltpu.CompilerParams(
            # d-scratch is carried across the N (j) sweep -> j must be "arbitrary";
            # only the M axis is safe to shard across TensorCores (v7x megacore).
            dimension_semantics=("parallel", "arbitrary", "arbitrary"),
            vmem_limit_bytes=48 * 1024 * 1024,
        ),
        cost_estimate=cost,
    )(x, w_org_t, b, w_down_t, w_up_eff)

    return out[:M, :out_dim]


def _run_case(key, batch, seq, in_dim, out_dim, lora_dim_factor, multiplier,
              *, compute_dtype=None, tm=256, tn_cap=512, tk_cap=512,
              atol=2e-2, rtol=2e-2):
    """Build GATINGLoRAModule-consistent params, run the kernel, check vs pure-JAX ref."""
    lora_dim_param = 4
    # lora_dim_factor != 0  =>  r = max(1, max(in, out) // factor)
    r = max(1, max(in_dim, out_dim) // lora_dim_factor)
    scale = lora_dim_param / r

    k_x, k_worg, k_borg, k_down, k_up, k_gate = jax.random.split(key, 6)
    x = jax.random.normal(k_x, (batch, seq, in_dim), dtype=jnp.float32)

    # org nn.Linear(in_dim, out_dim): weight [out, in], bias [out]
    w_org = jax.random.normal(k_worg, (out_dim, in_dim), dtype=jnp.float32) * 0.1
    b_org = jax.random.normal(k_borg, (out_dim,), dtype=jnp.float32) * 0.1
    # lora_down = nn.Linear(in_dim, r, bias=False), kaiming_uniform-ish bound
    bound = 1.0 / float(in_dim) ** 0.5
    w_down = jax.random.uniform(k_down, (r, in_dim), dtype=jnp.float32,
                                minval=-bound, maxval=bound)
    # lora_up is zero-init in the module; use nonzero here so gate/up-path bugs show.
    w_up = jax.random.normal(k_up, (out_dim, r), dtype=jnp.float32) * 0.5
    # lora_gate = nn.Parameter(torch.randn(1, r))
    gate = jax.random.normal(k_gate, (1, r), dtype=jnp.float32)

    # One-time prepare (transposes / fold / padding hoisted out of per-call path).
    params, out_dim_p = prepare_gating_lora_params(
        w_org, b_org, w_down, w_up, gate,
        multiplier=multiplier, scale=scale, compute_dtype=compute_dtype)

    x2d = x.reshape(batch * seq, in_dim)
    out2d = gating_lora_linear(x2d, params, out_dim_p,
                               tm=tm, tn_cap=tn_cap, tk_cap=tk_cap)
    out = jax.block_until_ready(out2d).reshape(batch, seq, out_dim)

    # pure-JAX reference of the exact PyTorch forward semantics
    hi = jax.lax.Precision.HIGHEST
    ref_org = jnp.dot(x, w_org.T, precision=hi) + b_org
    ref_lora = jnp.dot(jnp.dot(x, w_down.T, precision=hi) * gate, w_up.T, precision=hi)
    ref = ref_org + ref_lora * multiplier * scale

    assert out.shape == (batch, seq, out_dim)
    err = float(jnp.max(jnp.abs(out.astype(jnp.float32) - ref)))
    assert jnp.allclose(out.astype(jnp.float32), ref, atol=atol, rtol=rtol), \
        f"mismatch vs reference (max abs err = {err})"


if __name__ == "__main__":
    key = jax.random.PRNGKey(0)
    k1, k2, k3 = jax.random.split(key, 3)

    # Case 1: small module-consistent shapes (single grid step per axis).
    _run_case(k1, batch=2, seq=8, in_dim=32, out_dim=32,
              lora_dim_factor=1, multiplier=1.0)

    # Case 2: non-128-multiple dims (K/N/r padding) + full M/N/K tiling; exercises
    # the j-gated LoRA-down reuse across N tiles and the pinned W_down index map
    # (grid = (2, 3, 2), r = 160 -> r_pad = 256).
    _run_case(k2, batch=2, seq=64, in_dim=200, out_dim=320,
              lora_dim_factor=2, multiplier=0.7,
              tm=64, tn_cap=128, tk_cap=128)

    # Case 3: bf16 compute (f32 accumulators), the preferred dtype for v6e/v7x MXU.
    _run_case(k3, batch=2, seq=64, in_dim=256, out_dim=256,
              lora_dim_factor=4, multiplier=1.0,
              compute_dtype=jnp.bfloat16, atol=1e-1, rtol=5e-2)

    print("KERNEL_OK")
</pallas_src>

<mosaic_0001>
module attributes {stable_mosaic.version = 11 : i64} {
  func.func @_gating_lora_kernel(%arg0: i32, %arg1: i32, %arg2: i32, %arg3: memref<16x128xf32, #tpu.memory_space<vmem>>, %arg4: memref<128x128xf32, #tpu.memory_space<vmem>>, %arg5: memref<1x128xf32, #tpu.memory_space<vmem>>, %arg6: memref<128x128xf32, #tpu.memory_space<vmem>>, %arg7: memref<128x128xf32, #tpu.memory_space<vmem>>, %arg8: memref<16x128xf32, #tpu.memory_space<vmem>>, %arg9: memref<16x128xf32, #tpu.memory_space<vmem>>, %arg10: memref<16x128xf32, #tpu.memory_space<vmem>>) attributes {dimension_semantics = [#tpu.dimension_semantics<parallel>, #tpu.dimension_semantics<arbitrary>, #tpu.dimension_semantics<arbitrary>], iteration_bounds = array<i64: 1, 1, 1>, scalar_prefetch = 0 : i64, scratch_operands = 2 : i64, tpu.core_type = #tpu.core_type<tc>, window_params = [{transform_indices = @transform_0, window_bounds = array<i64: 16, 128>}, {transform_indices = @transform_1, window_bounds = array<i64: 128, 128>}, {transform_indices = @transform_2, window_bounds = array<i64: 1, 128>}, {transform_indices = @transform_3, window_bounds = array<i64: 128, 128>}, {transform_indices = @transform_4, window_bounds = array<i64: 128, 128>}, {transform_indices = @transform_5, window_bounds = array<i64: 16, 128>}]} {
    %c0_i32 = arith.constant 0 : i32
    %0 = arith.cmpi eq, %arg2, %c0_i32 : i32
    %1 = arith.extui %0 : i1 to i32
    %c0_i32_0 = arith.constant 0 : i32
    %2 = arith.cmpi ne, %1, %c0_i32_0 : i32
    scf.if %2 {
      %c0_15 = arith.constant 0 : index
      %c0_16 = arith.constant 0 : index
      %20 = vector.load %arg5[%c0_15, %c0_16] : memref<1x128xf32, #tpu.memory_space<vmem>>, vector<1x128xf32>
      %21 = vector.shape_cast %20 : vector<1x128xf32> to vector<1x128xf32>
      %22 = vector.broadcast %21 : vector<1x128xf32> to vector<16x128xf32>
      %c0_17 = arith.constant 0 : index
      %c0_18 = arith.constant 0 : index
      %23 = vector.load %arg9[%c0_17, %c0_18] : memref<16x128xf32, #tpu.memory_space<vmem>>, vector<16x128xf32>
      tpu.vector_store %arg9[%c0_17, %c0_18], %22 {strides = array<i32>} : memref<16x128xf32, #tpu.memory_space<vmem>>, vector<16x128xf32>,
    } else {
    }
    %c0 = arith.constant 0 : index
    %c0_1 = arith.constant 0 : index
    %3 = vector.load %arg3[%c0, %c0_1] : memref<16x128xf32, #tpu.memory_space<vmem>>, vector<16x128xf32>
    %c0_2 = arith.constant 0 : index
    %c0_3 = arith.constant 0 : index
    %4 = vector.load %arg9[%c0_2, %c0_3] : memref<16x128xf32, #tpu.memory_space<vmem>>, vector<16x128xf32>
    %c0_4 = arith.constant 0 : index
    %c0_5 = arith.constant 0 : index
    %5 = vector.load %arg4[%c0_4, %c0_5] : memref<128x128xf32, #tpu.memory_space<vmem>>, vector<128x128xf32>
    %cst = arith.constant dense<0.000000e+00> : vector<16x128xf32>
    %6 = tpu.matmul %3, %5, %cst {dimension_numbers = #tpu.dot_dimension_numbers<[1], [0], [0], [1], [0, 0, 1, 1], [], []>} : vector<16x128xf32>, vector<128x128xf32>, vector<16x128xf32> -> vector<16x128xf32>
    %7 = arith.addf %4, %6 : vector<16x128xf32>
    %c0_6 = arith.constant 0 : index
    %c0_7 = arith.constant 0 : index
    %8 = vector.load %arg9[%c0_6, %c0_7] : memref<16x128xf32, #tpu.memory_space<vmem>>, vector<16x128xf32>
    tpu.vector_store %arg9[%c0_6, %c0_7], %7 {strides = array<i32>} : memref<16x128xf32, #tpu.memory_space<vmem>>, vector<16x128xf32>,
    %c0_i32_8 = arith.constant 0 : i32
    %9 = arith.cmpi eq, %arg1, %c0_i32_8 : i32
    %c0_i32_9 = arith.constant 0 : i32
    %10 = arith.cmpi eq, %arg2, %c0_i32_9 : i32
    %11 = arith.andi %9, %10 : i1
    %12 = arith.extui %11 : i1 to i32
    %c0_i32_10 = arith.constant 0 : i32
    %13 = arith.cmpi ne, %12, %c0_i32_10 : i32
    scf.if %13 {
      %cst_15 = arith.constant 0.000000e+00 : f32
      %20 = vector.broadcast %cst_15 : f32 to vector<16x128xf32>
      %c0_16 = arith.constant 0 : index
      %c0_17 = arith.constant 0 : index
      %21 = vector.load %arg10[%c0_16, %c0_17] : memref<16x128xf32, #tpu.memory_space<vmem>>, vector<16x128xf32>
      tpu.vector_store %arg10[%c0_16, %c0_17], %20 {strides = array<i32>} : memref<16x128xf32, #tpu.memory_space<vmem>>, vector<16x128xf32>,
    } else {
    }
    %c0_i32_11 = arith.constant 0 : i32
    %14 = arith.cmpi eq, %arg1, %c0_i32_11 : i32
    %15 = arith.extui %14 : i1 to i32
    %c0_i32_12 = arith.constant 0 : i32
    %16 = arith.cmpi ne, %15, %c0_i32_12 : i32
    scf.if %16 {
      %c0_15 = arith.constant 0 : index
      %c0_16 = arith.constant 0 : index
      %20 = vector.load %arg10[%c0_15, %c0_16] : memref<16x128xf32, #tpu.memory_space<vmem>>, vector<16x128xf32>
      %c0_17 = arith.constant 0 : index
      %c0_18 = arith.constant 0 : index
      %21 = vector.load %arg6[%c0_17, %c0_18] : memref<128x128xf32, #tpu.memory_space<vmem>>, vector<128x128xf32>
      %cst_19 = arith.constant dense<0.000000e+00> : vector<16x128xf32>
      %22 = tpu.matmul %3, %21, %cst_19 {dimension_numbers = #tpu.dot_dimension_numbers<[1], [0], [0], [1], [0, 0, 1, 1], [], []>} : vector<16x128xf32>, vector<128x128xf32>, vector<16x128xf32> -> vector<16x128xf32>
      %23 = arith.addf %20, %22 : vector<16x128xf32>
      %c0_20 = arith.constant 0 : index
      %c0_21 = arith.constant 0 : index
      %24 = vector.load %arg10[%c0_20, %c0_21] : memref<16x128xf32, #tpu.memory_space<vmem>>, vector<16x128xf32>
      tpu.vector_store %arg10[%c0_20, %c0_21], %23 {strides = array<i32>} : memref<16x128xf32, #tpu.memory_space<vmem>>, vector<16x128xf32>,
    } else {
    }
    %c0_i32_13 = arith.constant 0 : i32
    %17 = arith.cmpi eq, %arg2, %c0_i32_13 : i32
    %18 = arith.extui %17 : i1 to i32
    %c0_i32_14 = arith.constant 0 : i32
    %19 = arith.cmpi ne, %18, %c0_i32_14 : i32
    scf.if %19 {
      %c0_15 = arith.constant 0 : index
      %c0_16 = arith.constant 0 : index
      %20 = vector.load %arg10[%c0_15, %c0_16] : memref<16x128xf32, #tpu.memory_space<vmem>>, vector<16x128xf32>
      %c0_17 = arith.constant 0 : index
      %c0_18 = arith.constant 0 : index
      %21 = vector.load %arg7[%c0_17, %c0_18] : memref<128x128xf32, #tpu.memory_space<vmem>>, vector<128x128xf32>
      %cst_19 = arith.constant dense<0.000000e+00> : vector<16x128xf32>
      %22 = tpu.matmul %20, %21, %cst_19 {dimension_numbers = #tpu.dot_dimension_numbers<[1], [0], [0], [1], [0, 0, 1, 1], [], []>} : vector<16x128xf32>, vector<128x128xf32>, vector<16x128xf32> -> vector<16x128xf32>
      %c0_20 = arith.constant 0 : index
      %c0_21 = arith.constant 0 : index
      %23 = vector.load %arg9[%c0_20, %c0_21] : memref<16x128xf32, #tpu.memory_space<vmem>>, vector<16x128xf32>
      %24 = arith.addf %23, %22 : vector<16x128xf32>
      %c0_22 = arith.constant 0 : index
      %c0_23 = arith.constant 0 : index
      %25 = vector.load %arg8[%c0_22, %c0_23] : memref<16x128xf32, #tpu.memory_space<vmem>>, vector<16x128xf32>
      tpu.vector_store %arg8[%c0_22, %c0_23], %24 {strides = array<i32>} : memref<16x128xf32, #tpu.memory_space<vmem>>, vector<16x128xf32>,
    } else {
    }
    return
  }
  func.func @transform_0(%arg0: i32, %arg1: i32, %arg2: i32) -> (i32, i32) {
    %c0_i32 = arith.constant 0 : i32
    return %arg0, %arg2 : i32, i32
  }
  func.func @transform_1(%arg0: i32, %arg1: i32, %arg2: i32) -> (i32, i32) {
    %c0_i32 = arith.constant 0 : i32
    return %arg2, %arg1 : i32, i32
  }
  func.func @transform_2(%arg0: i32, %arg1: i32, %arg2: i32) -> (i32, i32) {
    %c0_i32 = arith.constant 0 : i32
    %c0_i32_0 = arith.constant 0 : i32
    return %c0_i32, %arg1 : i32, i32
  }
  func.func @transform_3(%arg0: i32, %arg1: i32, %arg2: i32) -> (i32, i32) {
    %c1_i32 = arith.constant 1 : i32
    %0 = arith.muli %arg1, %c1_i32 : i32
    %1 = arith.addi %arg2, %0 : i32
    %c0_i32 = arith.constant 0 : i32
    %2 = arith.minsi %1, %c0_i32 : i32
    %c0_i32_0 = arith.constant 0 : i32
    %c0_i32_1 = arith.constant 0 : i32
    return %2, %c0_i32_0 : i32, i32
  }
  func.func @transform_4(%arg0: i32, %arg1: i32, %arg2: i32) -> (i32, i32) {
    %c0_i32 = arith.constant 0 : i32
    %c0_i32_0 = arith.constant 0 : i32
    return %c0_i32, %arg1 : i32, i32
  }
  func.func @transform_5(%arg0: i32, %arg1: i32, %arg2: i32) -> (i32, i32) {
    %c0_i32 = arith.constant 0 : i32
    return %arg0, %arg1 : i32, i32
  }
}

</mosaic_0001>

<bundles_post_ra>
// kernel: tpu_custom_call.1
= control target key start
LH: loop header
LB: loop body
LE: loop exit
PB: predicated region body
PF: predicated region fallthrough
CT: control target
= control target key end

     0   :  { %10 = vsyncpa [#allocation5], 0  ;;  %s501_s0 = inlined_call_operand.hbm [shape: f32[16,128], index: 0, kind: input, shape index: {}]   ;;  %s502_s1 = inlined_call_operand.hbm [shape: f32[128,128], index: 1, kind: input, shape index: {}]   ;;  %s503_s2 = inlined_call_operand.vmem [shape: f32[1,128], index: 2, kind: input, shape index: {}]   ;;  %s504_s3 = inlined_call_operand.hbm [shape: f32[128,128], index: 3, kind: input, shape index: {}]   ;;  %s505_s4 = inlined_call_operand.hbm [shape: f32[128,128], index: 4, kind: input, shape index: {}]   ;;  %s506_s5 = inlined_call_operand.hbm [shape: f32[16,128], index: 5, kind: output, shape index: {}]  }
   0x1   :  { %11 = vsyncpa [#allocation8], 0 }
   0x2   :  { %12 = vsyncpa [#allocation11], 0 }
   0x3   :  { %13 = vsyncpa [#allocation6], 0  ;;  %s31_s20 = sshll.u32 %s502_s1, 4  ;;  %s431_s21 = smov [#allocation7]   ;;  %s32_s20 = int_to_ptr.hbm [resolvable:$true] %s31_s20 }
   0x4   :  { %s33_s22 = sshll.u32 %s431_s21, 4  ;;  %s18_s25 = sshll.u32 %s501_s0, 4  ;;  %s34_s22 = int_to_ptr.vmem [resolvable:$true] %s33_s22  ;;  %s19_s25 = int_to_ptr.hbm [resolvable:$true] %s18_s25 }
   0x5   :  { %s432_s26 = smov 128   ;;  %s433_s27 = smov 8  }
   0x6   :  { %39 = dma.hbm_to_vmem [thread:$0]  %s32_s20, 2048, %s34_s22, [#allocation8], %s432_s26, %s432_s26, %s433_s27  }
   0x7   :  { %s434_s28 = smov [#allocation4]   ;;  %s52_s1 = sshll.u32 %s504_s3, 4  ;;  %s53_s1 = int_to_ptr.hbm [resolvable:$true] %s52_s1 }
   0x8   :  { %s20_s29 = sshll.u32 %s434_s28, 4  ;;  %s65_s8 = sshll.u32 %s505_s4, 4  ;;  %s21_s29 = int_to_ptr.vmem [resolvable:$true] %s20_s29  ;;  %s66_s8 = int_to_ptr.hbm [resolvable:$true] %s65_s8 }
   0x9   :  { %26 = dma.hbm_to_vmem [thread:$0]  %s19_s25, 256, %s21_s29, [#allocation5], %s432_s26, %s432_s26, %s433_s27  }
   0xa   :  { %s435_s9 = smov [#allocation9]   ;;  %s436_s11 = smov [#allocation10]  }
   0xb   :  { %s54_s10 = sshll.u32 %s435_s9, 4  ;;  %s67_s3 = sshll.u32 %s436_s11, 4  ;;  %s55_s10 = int_to_ptr.vmem [resolvable:$true] %s54_s10  ;;  %s68_s3 = int_to_ptr.vmem [resolvable:$true] %s67_s3 }
   0xc   :  { %60 = dma.hbm_to_vmem [thread:$0]  %s53_s1, 2048, %s55_s10, [#allocation8], %s432_s26, %s432_s26, %s433_s27  }
   0xd   :  { %73 = dma.hbm_to_vmem [thread:$0]  %s66_s8, 2048, %s68_s3, [#allocation11], %s432_s26, %s432_s26, %s433_s27  }
   0xe   :  { %423 = dma.done.wait [#allocation5], 256  }
   0xf   :  { %424 = vsyncadd [#allocation5], 4294967040 }
  0x10   :  { %425 = dma.done.wait [#allocation8], 4096  }
  0x11   :  { %426 = vsyncadd [#allocation8], 4294963200 }
  0x12   :  { %427 = dma.done.wait [#allocation11], 2048  }
  0x13   :  { %428 = vsyncadd [#allocation11], 4294965248  ;;  %v178_v0 = vld [vmem:[#allocation9 + $0x78] sm:$0xff]  ;;  %v177_v1 = vld [vmem:[#allocation9 + $0x70] sm:$0xff]  ;;  %s437_s13 = smov [#allocation12]   ;;  %s262_s17 = sshll.u32 %s506_s5, 4  ;;  %s263_s17 = int_to_ptr.hbm [resolvable:$true] %s262_s17 }
  0x14   :  { %179 = vmatpush.msra.mxu1 %v178_v0  ;;  %v176_v2 = vld [vmem:[#allocation9 + $0x68] sm:$0xff]  ;;  %v175_v3 = vld [vmem:[#allocation9 + $0x60] sm:$0xff]  ;;  %v174_v4 = vld [vmem:[#allocation9 + $0x58] sm:$0xff]  ;;  %s260_s14 = sshll.u32 %s437_s13, 4  ;;  %s261_s14 = int_to_ptr.vmem [resolvable:$true] %s260_s14 }
  0x15   :  { %v173_v5 = vld [vmem:[#allocation9 + $0x50] sm:$0xff]  ;;  %v226_v6 = vld [vmem:[#allocation10 + $0x78] sm:$0xff]  ;;  %v172_v10 = vld [vmem:[#allocation9 + $0x48] sm:$0xff] }
  0x16   :  { %180 = vmatpush.msra.mxu1 %v177_v1  ;;  %v225_v7 = vld [vmem:[#allocation10 + $0x70] sm:$0xff]  ;;  %v123_v8 = vld [vmem:[#allocation7 + $0x78] sm:$0xff]  ;;  %227 = vmatpush.msra.mxu2 %v226_v6  ;;  %v224_v11 = vld [vmem:[#allocation10 + $0x68] sm:$0xff] }
  0x17   :  { %v122_v9 = vld [vmem:[#allocation7 + $0x70] sm:$0xff]  ;;  %124 = vmatpush.msra.mxu0 %v123_v8  ;;  %279 = vmatpush.msra.mxu3 %v123_v8  ;;  %v121_v12 = vld [vmem:[#allocation7 + $0x68] sm:$0xff]  ;;  %v171_v13 = vld [vmem:[#allocation9 + $0x40] sm:$0xff] }
  0x18   :  { %181 = vmatpush.msra.mxu1 %v176_v2  ;;  %228 = vmatpush.msra.mxu2 %v225_v7  ;;  %v223_v14 = vld [vmem:[#allocation10 + $0x60] sm:$0xff]  ;;  %v170_v16 = vld [vmem:[#allocation9 + $0x38] sm:$0xff]  ;;  %v169_v19 = vld [vmem:[#allocation9 + $0x30] sm:$0xff] }
  0x19   :  { %125 = vmatpush.msra.mxu0 %v122_v9  ;;  %280 = vmatpush.msra.mxu3 %v122_v9  ;;  %v120_v15 = vld [vmem:[#allocation7 + $0x60] sm:$0xff]  ;;  %v222_v17 = vld [vmem:[#allocation10 + $0x58] sm:$0xff]  ;;  %v221_v20 = vld [vmem:[#allocation10 + $0x50] sm:$0xff] }
  0x1a   :  { %182 = vmatpush.msra.mxu1 %v175_v3  ;;  %229 = vmatpush.msra.mxu2 %v224_v11  ;;  %v119_v18 = vld [vmem:[#allocation7 + $0x58] sm:$0xff]  ;;  %v118_v21 = vld [vmem:[#allocation7 + $0x50] sm:$0xff]  ;;  %v168_v22 = vld [vmem:[#allocation9 + $0x28] sm:$0xff] }
  0x1b   :  { %126 = vmatpush.msra.mxu0 %v121_v12  ;;  %281 = vmatpush.msra.mxu3 %v121_v12  ;;  %v220_v23 = vld [vmem:[#allocation10 + $0x48] sm:$0xff]  ;;  %v167_v25 = vld [vmem:[#allocation9 + $0x20] sm:$0xff]  ;;  %v166_v28 = vld [vmem:[#allocation9 + $0x18] sm:$0xff] }
  0x1c   :  { %183 = vmatpush.msra.mxu1 %v174_v4  ;;  %230 = vmatpush.msra.mxu2 %v223_v14  ;;  %v117_v24 = vld [vmem:[#allocation7 + $0x48] sm:$0xff]  ;;  %v219_v26 = vld [vmem:[#allocation10 + $0x40] sm:$0xff]  ;;  %v218_v29 = vld [vmem:[#allocation10 + $0x38] sm:$0xff] }
  0x1d   :  { %127 = vmatpush.msra.mxu0 %v120_v15  ;;  %282 = vmatpush.msra.mxu3 %v120_v15  ;;  %v116_v27 = vld [vmem:[#allocation7 + $0x40] sm:$0xff]  ;;  %v115_v30 = vld [vmem:[#allocation7 + $0x38] sm:$0xff]  ;;  %v165_v31 = vld [vmem:[#allocation9 + $0x10] sm:$0xff] }
  0x1e   :  { %184 = vmatpush.msra.mxu1 %v173_v5  ;;  %231 = vmatpush.msra.mxu2 %v222_v17  ;;  %v217_v32 = vld [vmem:[#allocation10 + $0x30] sm:$0xff]  ;;  %v164_v34 = vld [vmem:[#allocation9 + $0x8] sm:$0xff]  ;;  %v163_v37 = vld [vmem:[#allocation9] sm:$0xff] }
  0x1f   :  { %128 = vmatpush.msra.mxu0 %v119_v18  ;;  %283 = vmatpush.msra.mxu3 %v119_v18  ;;  %v114_v33 = vld [vmem:[#allocation7 + $0x30] sm:$0xff]  ;;  %v216_v35 = vld [vmem:[#allocation10 + $0x28] sm:$0xff]  ;;  %v215_v38 = vld [vmem:[#allocation10 + $0x20] sm:$0xff] }
  0x20   :  { %185 = vmatpush.msra.mxu1 %v172_v10  ;;  %232 = vmatpush.msra.mxu2 %v221_v20  ;;  %v113_v36 = vld [vmem:[#allocation7 + $0x28] sm:$0xff]  ;;  %v104_v39 = vld [vmem:[#allocation4] sm:$0xff]  ;;  %v112_v40 = vld [vmem:[#allocation7 + $0x20] sm:$0xff] }
  0x21   :  { %129 = vmatpush.msra.mxu0 %v118_v21  ;;  %284 = vmatpush.msra.mxu3 %v118_v21  ;;  %v214_v41 = vld [vmem:[#allocation10 + $0x18] sm:$0xff]  ;;  %v213_v43 = vld [vmem:[#allocation10 + $0x10] sm:$0xff]  ;;  %v212_v45 = vld [vmem:[#allocation10 + $0x8] sm:$0xff] }
  0x22   :  { %186 = vmatpush.msra.mxu1 %v171_v13  ;;  %233 = vmatpush.msra.mxu2 %v220_v23  ;;  %v111_v42 = vld [vmem:[#allocation7 + $0x18] sm:$0xff]  ;;  %v110_v44 = vld [vmem:[#allocation7 + $0x10] sm:$0xff]  ;;  %v211_v47 = vld [vmem:[#allocation10] sm:$0xff] }
  0x23   :  { %130 = vmatpush.msra.mxu0 %v117_v24  ;;  %285 = vmatpush.msra.mxu3 %v117_v24  ;;  %v105_v46 = vld [vmem:[#allocation4 + $0x8] sm:$0xff]  ;;  %v109_v48 = vld [vmem:[#allocation7 + $0x8] sm:$0xff]  ;;  %v108_v49 = vld [vmem:[#allocation7] sm:$0xff] }
  0x24   :  { %187 = vmatpush.msra.mxu1 %v170_v16  ;;  %234 = vmatpush.msra.mxu2 %v219_v26  ;;  %v302_v52 = vld [vmem:[%s503_s2] ss:$0 sm:$0xff] }
  0x25   :  { %131 = vmatpush.msra.mxu0 %v116_v27  ;;  %286 = vmatpush.msra.mxu3 %v116_v27 }
  0x26   :  { %188 = vmatpush.msra.mxu1 %v169_v19  ;;  %235 = vmatpush.msra.mxu2 %v218_v29 }
  0x27   :  { %132 = vmatpush.msra.mxu0 %v115_v30  ;;  %287 = vmatpush.msra.mxu3 %v115_v30 }
  0x28   :  { %189 = vmatpush.msra.mxu1 %v168_v22  ;;  %236 = vmatpush.msra.mxu2 %v217_v32 }
  0x29   :  { %133 = vmatpush.msra.mxu0 %v114_v33  ;;  %288 = vmatpush.msra.mxu3 %v114_v33 }
  0x2a   :  { %190 = vmatpush.msra.mxu1 %v167_v25  ;;  %237 = vmatpush.msra.mxu2 %v216_v35 }
  0x2b   :  { %134 = vmatpush.msra.mxu0 %v113_v36  ;;  %289 = vmatpush.msra.mxu3 %v113_v36 }
  0x2c   :  { %191 = vmatpush.msra.mxu1 %v166_v28  ;;  %238 = vmatpush.msra.mxu2 %v215_v38 }
  0x2d   :  { %135 = vmatpush.msra.mxu0 %v112_v40  ;;  %290 = vmatpush.msra.mxu3 %v112_v40 }
  0x2e   :  { %192 = vmatpush.msra.mxu1 %v165_v31  ;;  %239 = vmatpush.msra.mxu2 %v214_v41 }
  0x2f   :  { %136 = vmatpush.msra.mxu0 %v111_v42  ;;  %291 = vmatpush.msra.mxu3 %v111_v42 }
  0x30   :  { %193 = vmatpush.msra.mxu1 %v164_v34  ;;  %240 = vmatpush.msra.mxu2 %v213_v43 }
  0x31   :  { %137 = vmatpush.msra.mxu0 %v110_v44  ;;  %292 = vmatpush.msra.mxu3 %v110_v44 }
  0x32   :  { %194 = vmatpush.msra.mxu1 %v163_v37  ;;  %241 = vmatpush.msra.mxu2 %v212_v45 }
  0x33   :  { %195 = vmatmul.f32.vlgmr.msra.gmra.mxu1 %v104_v39  ;;  %138 = vmatpush.msra.mxu0 %v109_v48 }
  0x34   :  { %242 = vmatpush.msra.mxu2 %v211_v47  ;;  %293 = vmatpush.msra.mxu3 %v109_v48 }
  0x35   :  { %139 = vmatpush.msra.mxu0 %v108_v49 }
  0x36   :  { %294 = vmatpush.msra.mxu3 %v108_v49  ;;  %140 = vmatmul.f32.vlgmr.msra.gmra.mxu0 %v104_v39 }
  0x37   :  { %143 = vmatmul.f32.vlgmr.msra.gmra.mxu3 %v105_v46 }
  0x3b   :  { %198 = vmatmul.f32.gmra.mxu1 %v105_v46 }
  0xb0   :  { %v196_v50 = vpop.f32.mrf.mxu1 }
  0xb1   :  { %243 = vmatmul.f32.vlgmr.msra.gmra.mxu2 %v196_v50 }
  0xb3   :  { %v141_v53 = vpop.f32.mrf.mxu0 }
  0xb4   :  { %v147_v54 = vadd.f32 %v302_v52, %v141_v53 }
  0xb8   :  { %v199_v51 = vpop.f32.mrf.mxu1 }
  0xb9   :  { %246 = vmatmul.f32.gmra.mxu2 %v199_v51 }
  0xba   :  { %v144_v57 = vpop.f32.mrf.mxu3 }
  0xbb   :  { %v148_v58 = vadd.f32 %v302_v52, %v144_v57 }
 0x134   :  { %v244_v55 = vpop.f32.mrf.mxu2 }
 0x135   :  { %v252_v56 = vadd.f32 %v244_v55, %v147_v54 }
 0x137   :  { %254 = vst [vmem:[#allocation12] sm:$0xff] %v252_v56 }
 0x13c   :  { %v247_v59 = vpop.f32.mrf.mxu2 }
 0x13d   :  { %v253_v60 = vadd.f32 %v247_v59, %v148_v58 }
 0x13f   :  { %255 = vst [vmem:[#allocation12 + $0x8] sm:$0xff] %v253_v60 }
 0x140   :  { %268 = dma.vmem_to_hbm [thread:$0]  %s261_s14, 256, %s263_s17, [#allocation6], %s432_s26, %s432_s26, %s433_s27  }
 0x141   :  { %429 = dma.done.wait [#allocation6], 256  }
 0x142   :  { %430 = vsyncadd [#allocation6], 4294967040 }
 0x143   :  { %273 = vsyncpa [#allocation5], 1 }
 0x144   :  { %274 = vsyncpa [#allocation8], 1 }
 0x145   :  { %275 = vsyncpa [#allocation11], 1 }
 0x146   :  { %276 = vsyncpa [#allocation6], 1 }

</bundles_post_ra>
